<compile_context>
chip_gen: v6e
topology: v6e:2x2x1
jax: 0.10.0
libtpu: 0.0.40
codegen_flags: <defaults>
</compile_context>

<pallas_src>
import jax
import jax.numpy as jnp
from jax.experimental import pallas as pl
from jax.experimental.pallas import tpu as pltpu


def _round_up(x, m):
    return ((x + m - 1) // m) * m


def _vmem_capacity_bytes():
    # Generation-aware tiling; fall back to the smallest capacity (v7x, 64 MiB)
    # if the query is unavailable.
    try:
        return int(pltpu.get_tpu_info().vmem_capacity_bytes)
    except Exception:
        return 64 << 20


def _choose_tiles(B, N, H, itemsize):
    """Pick (bt, tn, vmem_limit).  tn is always full-N (N<=128) or a multiple of 128."""
    vmem = _vmem_capacity_bytes()
    # ~8 MiB p-tiles on v7x (64 MiB VMEM), ~16 MiB on v5e/v6e (128 MiB VMEM).
    budget = min(16 << 20, max(4 << 20, vmem // 8))

    tn_min = N if N <= 128 else 128
    bt = B
    if B >= 16 and B * H * tn_min * itemsize > budget:
        # Even one minimum-width passage tile at full batch blows the budget:
        # split the batch across a leading (parallel) grid axis rather than
        # shrinking tn below 128 lanes (keeps score stores lane-dense).
        bt = min(B, max(8, (budget // max(1, H * tn_min * itemsize)) // 8 * 8))

    if N <= 128:
        tn = N                                                  # single full-dim tile
    else:
        tn = max(128, (budget // max(1, bt * H * itemsize)) // 128 * 128)
        tn = min(tn, _round_up(N, 128))

    # Double-buffered p tiles + tiny q/score tiles; explicit limit so v5e's
    # 16 MiB default scoped limit is not binding and v7x keeps headroom under
    # its 64 MiB physical VMEM.
    vmem_limit = max(32 << 20, min(48 << 20, vmem - (8 << 20)))
    return bt, tn, vmem_limit


def _scores_kernel(q_ref, p_ref, scores_ref):
    """scores[b, n] = sum_h q[b, h] * p[b, n, h] for one (bt, tn) tile."""
    H = q_ref.shape[-1]
    q = q_ref[...].astype(jnp.float32)                      # (bt, H)  hoisted upcast
    acc = jnp.zeros(scores_ref.shape, jnp.float32)           # (bt, tn) f32 accumulator
    # Accumulate the H reduction in 128-lane chunks: bounds the f32 upcast and
    # broadcast-product intermediate to (bt, tn, <=128) regardless of H, so
    # enlarging the passage tile does not blow vreg/VMEM temporaries.
    for h0 in range(0, H, 128):
        hc = min(128, H - h0)
        pc = p_ref[:, :, h0:h0 + hc].astype(jnp.float32)      # (bt, tn, hc)
        qc = q[:, h0:h0 + hc]                                 # (bt, hc)
        acc = acc + jnp.sum(qc[:, None, :] * pc, axis=-1)     # VPU mul + XLU lane reduce
    scores_ref[...] = acc                                     # lane-dense store


@jax.jit
def retriever_scores(q_emb, p_embs):
    """Batched relevance scores: scores[b, n] = <q_emb[b], p_embs[b, n]>.

    q_emb:  (B, H)    float32 or bfloat16
    p_embs: (B, N, H) float32 or bfloat16  (pass bf16 to halve HBM traffic on this
                                            memory-bound stream; accumulation is f32)
    Returns scores (B, N) float32.
    """
    B, H = q_emb.shape
    Bp, N, Hp = p_embs.shape
    assert B == Bp and H == Hp

    itemsize = jnp.dtype(p_embs.dtype).itemsize
    bt, tn, vmem_limit = _choose_tiles(B, N, H, itemsize)
    grid = (pl.cdiv(B, bt), pl.cdiv(N, tn))

    return pl.pallas_call(
        _scores_kernel,
        out_shape=jax.ShapeDtypeStruct((B, N), jnp.float32),
        grid=grid,
        in_specs=[
            pl.BlockSpec((bt, H), lambda b, n: (b, 0)),          # q: resident per b-tile
            pl.BlockSpec((bt, tn, H), lambda b, n: (b, n, 0)),   # p: streamed over N
        ],
        out_specs=pl.BlockSpec((bt, tn), lambda b, n: (b, n)),   # scores: streamed over N
        compiler_params=pltpu.CompilerParams(
            dimension_semantics=("parallel", "parallel"),        # both axes shardable (v7x 2 TCs)
            vmem_limit_bytes=vmem_limit,
        ),
    )(q_emb, p_embs)


def embs_dot_product(p_embs, q_emb):
    """Pallas equivalent of the module-level embs_dot_product (torch.bmm path)."""
    return retriever_scores(q_emb, p_embs)


def predict(q_emb, p_embs):
    """Retriever.predict on already-embedded inputs.

    q_emb: (1, H), p_embs: (1, N, H)  -> (prediction index, normalized score).
    The softmax / argmax epilogue is O(N), exact, and runs in plain JAX outside
    the kernel (keeps the kernel grid fully parallel).
    """
    scores = retriever_scores(q_emb, p_embs)
    relevance = scores[0]                                 # .squeeze(0)
    normalized = jax.nn.softmax(relevance, axis=0)        # torch.nn.Softmax(dim=0)
    prediction = jnp.argmax(relevance)
    return prediction, normalized[prediction]


if __name__ == "__main__":
    # The only tensor the module itself owns (encoders / tokenizer are injected).
    dummy_tensor = jnp.ones((1,), dtype=jnp.float32)

    B, N, H = 2, 8, 32
    key = jax.random.PRNGKey(0)
    kq, kp = jax.random.split(key)
    q_emb = jax.random.normal(kq, (B, H), dtype=jnp.float32)
    p_embs = jax.random.normal(kp, (B, N, H), dtype=jnp.float32)

    # f32 path (exact semantics of the torch module).
    scores = retriever_scores(q_emb, p_embs)
    jax.block_until_ready(scores)

    ref_scores = jnp.einsum("bh,bnh->bn", q_emb, p_embs,
                            precision=jax.lax.Precision.HIGHEST)
    assert scores.shape == (B, N)
    assert jnp.allclose(scores, ref_scores, atol=1e-5, rtol=1e-5)

    probs = jax.nn.softmax(scores, axis=-1)
    ref_probs = jax.nn.softmax(ref_scores, axis=-1)
    assert jnp.allclose(probs, ref_probs, atol=1e-5, rtol=1e-5)

    # bf16 passage stream (memory-bound fast path; f32 accumulation in-kernel).
    scores_bf16 = retriever_scores(q_emb.astype(jnp.bfloat16),
                                   p_embs.astype(jnp.bfloat16))
    jax.block_until_ready(scores_bf16)
    ref_bf16 = jnp.einsum("bh,bnh->bn",
                          q_emb.astype(jnp.bfloat16).astype(jnp.float32),
                          p_embs.astype(jnp.bfloat16).astype(jnp.float32),
                          precision=jax.lax.Precision.HIGHEST)
    assert jnp.allclose(scores_bf16, ref_bf16, atol=1e-3, rtol=1e-3)

    # Predict path (batch of 1, like Retriever.predict).
    pred, norm_score = predict(q_emb[:1], p_embs[:1])
    jax.block_until_ready(norm_score)

    ref_rel = ref_scores[0]
    ref_p = jax.nn.softmax(ref_rel, axis=0)
    ref_pred = jnp.argmax(ref_rel)
    assert int(pred) == int(ref_pred)
    assert jnp.allclose(norm_score, ref_p[ref_pred], atol=1e-5, rtol=1e-5)

    print("KERNEL_OK")
</pallas_src>

<mosaic_0001>
module attributes {stable_mosaic.version = 11 : i64} {
  func.func @_scores_kernel(%arg0: i32, %arg1: i32, %arg2: memref<2x32xf32, #tpu.memory_space<vmem>>, %arg3: memref<2x8x32xf32, #tpu.memory_space<vmem>>, %arg4: memref<2x8xf32, #tpu.memory_space<vmem>>) attributes {dimension_semantics = [#tpu.dimension_semantics<parallel>, #tpu.dimension_semantics<parallel>], iteration_bounds = array<i64: 1, 1>, scalar_prefetch = 0 : i64, scratch_operands = 0 : i64, tpu.core_type = #tpu.core_type<tc>, window_params = [{transform_indices = @transform_0, window_bounds = array<i64: 2, 32>}, {transform_indices = @transform_1, window_bounds = array<i64: 2, 8, 32>}, {transform_indices = @transform_2, window_bounds = array<i64: 2, 8>}]} {
    %c0 = arith.constant 0 : index
    %c0_0 = arith.constant 0 : index
    %0 = vector.load %arg2[%c0, %c0_0] : memref<2x32xf32, #tpu.memory_space<vmem>>, vector<2x32xf32>
    %cst = arith.constant 0.000000e+00 : f32
    %1 = vector.broadcast %cst : f32 to vector<2x8xf32>
    %c0_1 = arith.constant 0 : index
    %c0_2 = arith.constant 0 : index
    %c0_3 = arith.constant 0 : index
    %2 = vector.load %arg3[%c0_1, %c0_2, %c0_3] : memref<2x8x32xf32, #tpu.memory_space<vmem>>, vector<2x8x32xf32>
    %3 = vector.shape_cast %0 : vector<2x32xf32> to vector<2x1x32xf32>
    %4 = vector.broadcast %3 : vector<2x1x32xf32> to vector<2x8x32xf32>
    %5 = arith.mulf %4, %2 : vector<2x8x32xf32>
    %cst_4 = arith.constant dense<0.000000e+00> : vector<2x8xf32>
    %6 = vector.multi_reduction <add>, %5, %cst_4 [2] : vector<2x8x32xf32> to vector<2x8xf32>
    %7 = arith.addf %1, %6 : vector<2x8xf32>
    %c0_5 = arith.constant 0 : index
    %c0_6 = arith.constant 0 : index
    %8 = vector.load %arg4[%c0_5, %c0_6] : memref<2x8xf32, #tpu.memory_space<vmem>>, vector<2x8xf32>
    tpu.vector_store %arg4[%c0_5, %c0_6], %7 {strides = array<i32>} : memref<2x8xf32, #tpu.memory_space<vmem>>, vector<2x8xf32>,
    return
  }
  func.func @transform_0(%arg0: i32, %arg1: i32) -> (i32, i32) {
    %c0_i32 = arith.constant 0 : i32
    %c0_i32_0 = arith.constant 0 : i32
    return %arg0, %c0_i32 : i32, i32
  }
  func.func @transform_1(%arg0: i32, %arg1: i32) -> (i32, i32, i32) {
    %c0_i32 = arith.constant 0 : i32
    %c0_i32_0 = arith.constant 0 : i32
    return %arg0, %arg1, %c0_i32 : i32, i32, i32
  }
  func.func @transform_2(%arg0: i32, %arg1: i32) -> (i32, i32) {
    %c0_i32 = arith.constant 0 : i32
    return %arg0, %arg1 : i32, i32
  }
}

</mosaic_0001>

<bundles_post_ra>
// kernel: retriever_scores.1
= control target key start
LH: loop header
LB: loop body
LE: loop exit
PB: predicated region body
PF: predicated region fallthrough
CT: control target
= control target key end

     0   :  { %7 = vsyncpa [#allocation3], 0  ;;  %s221_s0 = inlined_call_operand.hbm [shape: f32[2,32], index: 0, kind: input, shape index: {}]   ;;  %s222_s1 = inlined_call_operand.hbm [shape: f32[2,8,32], index: 1, kind: input, shape index: {}]   ;;  %s223_s2 = inlined_call_operand.hbm [shape: f32[2,8], index: 2, kind: output, shape index: {}]  }
   0x1   :  { %8 = vsyncpa [#allocation6], 0 }
   0x2   :  { %9 = vsyncpa [#allocation4], 0  ;;  %s191_s9 = smov [#allocation2]   ;;  %s192_s11 = smov [#allocation5]  }
   0x3   :  { %s16_s10 = sshll.u32 %s191_s9, 4  ;;  %s25_s12 = sshll.u32 %s192_s11, 4  ;;  %s17_s10 = int_to_ptr.vmem [resolvable:$true] %s16_s10  ;;  %s26_s12 = int_to_ptr.vmem [resolvable:$true] %s25_s12 }
   0x4   :  { %s133_s13 = scalar_lea.vmem %s17_s10, 32  ;;  %p138_p1 = scmp.lt.s32.totalorder %s17_s10, %s17_s10 }
   0x5   :  { %p134_p0 = scmp.ne.s32.totalorder %s17_s10, %s133_s13  ;;  %p139_p2 = scmp.lt.s32.totalorder %s133_s13, %s133_s13 }
   0x7   :  { %p140_p3 = por %p139_p2, %p138_p1 }
   0x9   :  { %p141_p4 = pnand %p140_p3, %p134_p0 }
   0xb   :  { %144 = shalt.err (!%p141_p4)
}
   0xc   :  { %19 = dma.hbm_to_vmem [thread:$0]  %s221_s0, 32, %s17_s10, [#allocation3]  }
   0xd   :  { %s153_s16 = scalar_lea.vmem %s26_s12, 256  ;;  %p158_p6 = scmp.lt.s32.totalorder %s26_s12, %s26_s12 }
   0xe   :  { %p154_p5 = scmp.ne.s32.totalorder %s26_s12, %s153_s16  ;;  %p159_p7 = scmp.lt.s32.totalorder %s153_s16, %s153_s16 }
  0x10   :  { %p160_p8 = por %p159_p7, %p158_p6 }
  0x12   :  { %p161_p9 = pnand %p160_p8, %p154_p5 }
  0x14   :  { %164 = shalt.err (!%p161_p9)
}
  0x15   :  { %s193_s17 = smov 128   ;;  %s194_s18 = smov 8  }
  0x16   :  { %31 = dma.hbm_to_vmem [thread:$0]  %s222_s1, 256, %s26_s12, [#allocation6], %s193_s17, %s193_s17, %s194_s18  }
  0x17   :  { %185 = dma.done.wait [#allocation3], 32  }
  0x18   :  { %186 = vsyncadd [#allocation3], 4294967264 }
  0x19   :  { %187 = dma.done.wait [#allocation6], 256  }
  0x1a   :  { %188 = vsyncadd [#allocation6], 4294967040  ;;  %v53_v0 = vlaneseq  ;;  %v195_v1 = vmov 1966171168   ;;  %v39_v12 = vld [vmem:[#allocation5] sm:$0xff]  ;;  %vm76_vm0 = vcmask 261120  }
  0x1b   :  { %v51_v2 = vunpack.c.l.s4 %v195_v1  ;;  %v118_v9 = vld.sshfl [vmem:[#allocation2] sm:$0x11 pattern:$0x75316420]  ;;  %v40_v15 = vld [vmem:[#allocation5 + $0x8] sm:$0xff]  ;;  %s196_s0 = smov [#allocation7]  }
  0x1c   :  { %v54_v3 = vshrl.u32 %v53_v0, 7  ;;  %v88_v4 = vand.u32 127, %v53_v0  ;;  %v49_v11 = vcombine.high %v118_v9, %v118_v9  ;;  %s108_s1 = sshll.u32 %s196_s0, 4  ;;  %vm97_vm1 = vcmask 1041409   ;;  %s109_s1 = int_to_ptr.vmem [resolvable:$true] %s108_s1 }
  0x1d   :  { %v52_v5 = vunpack.c.0.s8 %v51_v2  ;;  %vm100_vm2 = vcmask 58368   ;;  %s165_s21 = scalar_lea.vmem %s109_s1, 32  ;;  %p170_p11 = scmp.lt.s32.totalorder %s109_s1, %s109_s1 }
  0x1e   :  { %v91_v6 = vsub.s32 %v88_v4, %v54_v3  ;;  %v66_v8 = vsub.s32 0, %v54_v3  ;;  %p166_p10 = scmp.ne.s32.totalorder %s109_s1, %s165_s21  ;;  %p171_p12 = scmp.lt.s32.totalorder %s165_s21, %s165_s21 }
  0x1f   :  { %v55_v7 = vsub.s32 %v52_v5, %v54_v3 }
  0x20   :  { %p172_p13 = por %p171_p12, %p170_p11 }
  0x21   :  { %v56_v10 = vrot.slane %v118_v9, %v55_v7  ;;  %v63_v14 = vrot.slane %v49_v11, %v55_v7 }
  0x22   :  { %p173_p0 = pnand %p172_p13, %p166_p10 }
  0x23   :  { %v67_v13 = vrot.slane %v56_v10, %v66_v8  ;;  %v71_v17 = vrot.slane %v63_v14, %v66_v8 }
  0x25   :  { %v74_v16 = vmul.f32 %v67_v13, %v39_v12  ;;  %v75_v19 = vmul.f32 %v71_v17, %v40_v15 }
  0x27   :  { %v77_v18 = vsel %vm76_vm0, %v74_v16, 0.0  ;;  %v80_v20 = vsel %vm76_vm0, %v75_v19, 0.0 }
  0x28   :  { %78 = vadd.xlane.f32.xlu0 %v77_v18 }
  0x2c   :  { %81 = vadd.xlane.f32.xlu0 %v80_v20 }
  0xb1   :  { %v79_v21 = vpop.xlane.xlu0 %78 }
  0xb2   :  { %v92_v23 = vrot.slane %v79_v21, %v91_v6 }
  0xb5   :  { %v82_v22 = vpop.xlane.xlu0 %81 }
  0xb6   :  { %v96_v24 = vrot.slane %v82_v22, %v91_v6 }
  0xb8   :  { %v98_v25 = vsel %vm97_vm1, %v96_v24, %v92_v23 }
  0xb9   :  { %101 = vst.msk [vmem:[#allocation7] sm:$0x3] %vm100_vm2, %v98_v25 }
  0xba   :  { %176 = shalt.err (!%p173_p0)
}
  0xbb   :  { %111 = dma.vmem_to_hbm [thread:$0]  %s109_s1, 32, %s223_s2, [#allocation4]  }
  0xbc   :  { %189 = dma.done.wait [#allocation4], 32  }
  0xbd   :  { %190 = vsyncadd [#allocation4], 4294967264 }
  0xbe   :  { %115 = vsyncpa [#allocation3], 1 }
  0xbf   :  { %116 = vsyncpa [#allocation6], 1 }
  0xc0   :  { %117 = vsyncpa [#allocation4], 1 }

</bundles_post_ra>
